<compile_context>
chip_gen: v7x
topology: tpu7x:2x2x1
jax: 0.10.0
libtpu: 0.0.40
codegen_flags: <defaults>
</compile_context>

<pallas_src>
import functools

import jax
import jax.numpy as jnp
from jax.experimental import pallas as pl
from jax.experimental.pallas import tpu as pltpu


def _partial_sums_kernel(x_ref, y_ref, out_ref, *, rows, cols, block_rows,
                         tile_s, mask_rows, mask_cols):
    """Per-(row-block, S-block) partial reductions for dice + BCE-with-logits.

    x_ref, y_ref: (block_rows, tile_s) tiles (logits / one-hot target),
                  native dtype, cast to f32 here.
    out_ref:      (block_rows, 4) f32: [intersect, sum_pred, sum_gt, bce_sum]
                  partial sums over this spatial tile.
    """
    x = x_ref[...].astype(jnp.float32)
    y = y_ref[...].astype(jnp.float32)

    maskf = None
    if mask_rows or mask_cols:
        br, ts = x.shape
        valid = None
        if mask_rows:
            i = pl.program_id(0)
            row_ids = jax.lax.broadcasted_iota(jnp.int32, (br, ts), 0)
            valid = (row_ids + i * block_rows) < rows
        if mask_cols:
            j = pl.program_id(1)
            col_ids = jax.lax.broadcasted_iota(jnp.int32, (br, ts), 1)
            cm = (col_ids + j * tile_s) < cols
            valid = cm if valid is None else jnp.logical_and(valid, cm)
        # Sanitize possibly-garbage out-of-bounds tail data before any math.
        x = jnp.where(valid, x, 0.0)
        y = jnp.where(valid, y, 0.0)
        maskf = valid.astype(jnp.float32)

    # Shared-exp numerically-stable sigmoid + softplus (one EUP exp/element):
    #   e = exp(-|x|); sigmoid(x) = 1/(1+e) if x>=0 else e/(1+e)
    #   BCEWithLogits = max(x,0) - x*y + log1p(e)
    e = jnp.exp(-jnp.abs(x))
    inv = 1.0 / (1.0 + e)
    p = jnp.where(x >= 0, inv, e * inv)
    bce = jnp.maximum(x, 0.0) - x * y + jnp.log1p(e)

    if maskf is not None:
        p = p * maskf       # kill sigmoid(0)=0.5 on masked lanes
        bce = bce * maskf   # kill log(2) on masked lanes

    out_ref[:, 0:1] = jnp.sum(p * y, axis=-1, keepdims=True)
    out_ref[:, 1:2] = jnp.sum(p, axis=-1, keepdims=True)
    out_ref[:, 2:3] = jnp.sum(y, axis=-1, keepdims=True)
    out_ref[:, 3:4] = jnp.sum(bce, axis=-1, keepdims=True)


def _row_reductions(x2d, y2d):
    """Per-row [intersect, sum_pred, sum_gt, bce_sum] over a (R, S) problem."""
    R, S = x2d.shape

    # Row tiling: take all rows when small (typical nnUNet N*C), else 256.
    ROW_BLOCK_MAX = 256
    block_rows = R if R <= ROW_BLOCK_MAX else ROW_BLOCK_MAX

    # Spatial tiling: keep each input tile around 2 MiB f32 (~512K elements),
    # lane dim a multiple of 128 unless the full S fits in one tile.
    max_tile_s = max(128, ((512 * 1024) // block_rows) // 128 * 128)
    tile_s = S if S <= max_tile_s else max_tile_s

    n_rb = pl.cdiv(R, block_rows)
    n_sb = pl.cdiv(S, tile_s)

    mask_rows = (R % block_rows) != 0
    mask_cols = (S % tile_s) != 0

    kernel = functools.partial(
        _partial_sums_kernel, rows=R, cols=S, block_rows=block_rows,
        tile_s=tile_s, mask_rows=mask_rows, mask_cols=mask_cols)

    in_spec = pl.BlockSpec((block_rows, tile_s), lambda i, j: (i, j))
    # Single merged output: one (block_rows, 4) block per grid step.
    out_spec = pl.BlockSpec((None, None, block_rows, 4),
                            lambda i, j: (i, j, 0, 0))

    # 2 inputs x 2 pipeline buffers x tile, plus headroom.
    vmem_limit = int(2 * block_rows * tile_s
                     * (x2d.dtype.itemsize + y2d.dtype.itemsize)) + (8 << 20)

    partials = pl.pallas_call(
        kernel,
        out_shape=jax.ShapeDtypeStruct((n_rb, n_sb, block_rows, 4),
                                       jnp.float32),
        grid=(n_rb, n_sb),
        in_specs=[in_spec, in_spec],
        out_specs=out_spec,
        compiler_params=pltpu.CompilerParams(
            dimension_semantics=("parallel", "parallel"),
            vmem_limit_bytes=vmem_limit,
        ),
    )(x2d, y2d)

    # Finish the tiny cross-tile reduction in JAX; drop masked tail rows.
    sums = partials.sum(axis=1).reshape(n_rb * block_rows, 4)[:R]
    return sums[:, 0], sums[:, 1], sums[:, 2], sums[:, 3]


@functools.partial(jax.jit, static_argnames=("weight_ce", "weight_dice", "smooth"))
def dc_and_bce_loss(net_output, target, *, weight_ce=1.0, weight_dice=1.0,
                    smooth=1e-5):
    """Forward pass of DC_and_BCE_loss (use_ignore_label=False).

    net_output: (N, C, H, W) logits (NCHW), any float dtype.
    target:     (N, C, H, W) one-hot (float or int dtype).
    returns scalar float32 loss.
    """
    N, C, H, W = net_output.shape
    # No dtype cast here: the kernel reads native dtype and casts per-tile.
    x2d = net_output.reshape(N * C, H * W)
    y2d = target.reshape(N * C, H * W)

    intersect, sum_pred, sum_gt, bce_rowsum = _row_reductions(x2d, y2d)

    # ---- dice (MemoryEfficientSoftDiceLoss, batch_dice=False, do_bg=True) ----
    intersect = intersect.reshape(N, C)
    sum_pred = sum_pred.reshape(N, C)
    sum_gt = sum_gt.reshape(N, C)
    denom = jnp.clip(sum_gt + sum_pred + smooth, 1e-8)
    dc = (2.0 * intersect + smooth) / denom
    dc_loss = -jnp.mean(dc)

    # ---- BCE with logits, reduction='mean' over all elements ----
    ce_loss = jnp.sum(bce_rowsum) / (N * C * H * W)

    return weight_ce * ce_loss + weight_dice * dc_loss


def _reference_loss(net_output, target, weight_ce=1.0, weight_dice=1.0,
                    smooth=1e-5):
    """Pure-JAX reference mirroring the PyTorch module, for verification."""
    x = net_output.astype(jnp.float32)
    y = target.astype(jnp.float32)
    p = jax.nn.sigmoid(x)
    axes = (2, 3)
    intersect = jnp.sum(p * y, axis=axes)
    sum_pred = jnp.sum(p, axis=axes)
    sum_gt = jnp.sum(y, axis=axes)
    dc = (2.0 * intersect + smooth) / jnp.clip(sum_gt + sum_pred + smooth, 1e-8)
    dc_loss = -jnp.mean(dc)
    bce = jnp.maximum(x, 0.0) - x * y + jnp.log1p(jnp.exp(-jnp.abs(x)))
    ce_loss = jnp.mean(bce)
    return weight_ce * ce_loss + weight_dice * dc_loss


if __name__ == "__main__":
    key = jax.random.PRNGKey(0)
    k1, k2 = jax.random.split(key)

    N, C, H, W = 2, 4, 16, 16

    # logits (no nonlinearity applied by the "network", as the module requires)
    net_output = jax.random.normal(k1, (N, C, H, W), dtype=jnp.float32)

    # one-hot target over C region channels
    labels = jax.random.randint(k2, (N, H, W), 0, C)
    target = jax.nn.one_hot(labels, C, axis=1, dtype=jnp.float32)  # (N, C, H, W)

    out = dc_and_bce_loss(net_output, target)
    out = jax.block_until_ready(out)

    ref = _reference_loss(net_output, target)
    assert jnp.allclose(out, ref, rtol=1e-5, atol=1e-5), (out, ref)

    print("KERNEL_OK")
</pallas_src>

<mosaic_0001>
module attributes {stable_mosaic.version = 11 : i64} {
  func.func @_partial_sums_kernel(%arg0: i32, %arg1: i32, %arg2: memref<8x256xf32, #tpu.memory_space<vmem>>, %arg3: memref<8x256xf32, #tpu.memory_space<vmem>>, %arg4: memref<1x1x8x4xf32, #tpu.memory_space<vmem>>) attributes {dimension_semantics = [#tpu.dimension_semantics<parallel>, #tpu.dimension_semantics<parallel>], iteration_bounds = array<i64: 1, 1>, scalar_prefetch = 0 : i64, scratch_operands = 0 : i64, tpu.core_type = #tpu.core_type<tc>, window_params = [{transform_indices = @transform_0, window_bounds = array<i64: 8, 256>}, {transform_indices = @transform_1, window_bounds = array<i64: 8, 256>}, {transform_indices = @transform_2, window_bounds = array<i64: 1, 1, 8, 4>}]} {
    %c0 = arith.constant 0 : index
    %c0_0 = arith.constant 0 : index
    %0 = vector.load %arg2[%c0, %c0_0] : memref<8x256xf32, #tpu.memory_space<vmem>>, vector<8x256xf32>
    %c0_1 = arith.constant 0 : index
    %c0_2 = arith.constant 0 : index
    %1 = vector.load %arg3[%c0_1, %c0_2] : memref<8x256xf32, #tpu.memory_space<vmem>>, vector<8x256xf32>
    %2 = math.absf %0 : vector<8x256xf32>
    %cst = arith.constant 0.000000e+00 : f32
    %3 = vector.broadcast %cst : f32 to vector<8x256xf32>
    %4 = arith.subf %3, %2 : vector<8x256xf32>
    %5 = math.exp %4 : vector<8x256xf32>
    %cst_3 = arith.constant 1.000000e+00 : f32
    %6 = vector.broadcast %cst_3 : f32 to vector<8x256xf32>
    %7 = arith.addf %6, %5 : vector<8x256xf32>
    %cst_4 = arith.constant 1.000000e+00 : f32
    %8 = vector.broadcast %cst_4 : f32 to vector<8x256xf32>
    %9 = arith.divf %8, %7 : vector<8x256xf32>
    %cst_5 = arith.constant 0.000000e+00 : f32
    %10 = vector.broadcast %cst_5 : f32 to vector<8x256xf32>
    %11 = arith.cmpf oge, %0, %10 : vector<8x256xf32>
    %12 = arith.mulf %5, %9 : vector<8x256xf32>
    %13 = arith.select %11, %9, %12 : vector<8x256xi1>, vector<8x256xf32>
    %cst_6 = arith.constant 0.000000e+00 : f32
    %14 = vector.broadcast %cst_6 : f32 to vector<8x256xf32>
    %15 = arith.maximumf %0, %14 : vector<8x256xf32>
    %16 = arith.mulf %0, %1 : vector<8x256xf32>
    %17 = arith.subf %15, %16 : vector<8x256xf32>
    %18 = math.log1p %5 : vector<8x256xf32>
    %19 = arith.addf %17, %18 : vector<8x256xf32>
    %20 = arith.mulf %13, %1 : vector<8x256xf32>
    %cst_7 = arith.constant dense<0.000000e+00> : vector<8xf32>
    %21 = vector.multi_reduction <add>, %20, %cst_7 [1] : vector<8x256xf32> to vector<8xf32>
    %22 = vector.shape_cast %21 : vector<8xf32> to vector<8x1xf32>
    %c0_8 = arith.constant 0 : index
    %c0_9 = arith.constant 0 : index
    %c0_10 = arith.constant 0 : index
    %c0_11 = arith.constant 0 : index
    %23 = vector.load %arg4[%c0_8, %c0_9, %c0_10, %c0_11] : memref<1x1x8x4xf32, #tpu.memory_space<vmem>>, vector<1x1x8x1xf32>
    %24 = vector.shape_cast %23 : vector<1x1x8x1xf32> to vector<8x1xf32>
    %25 = vector.shape_cast %22 : vector<8x1xf32> to vector<1x1x8x1xf32>
    tpu.vector_store %arg4[%c0_8, %c0_9, %c0_10, %c0_11], %25 {strides = array<i32>} : memref<1x1x8x4xf32, #tpu.memory_space<vmem>>, vector<1x1x8x1xf32>,
    %cst_12 = arith.constant dense<0.000000e+00> : vector<8xf32>
    %26 = vector.multi_reduction <add>, %13, %cst_12 [1] : vector<8x256xf32> to vector<8xf32>
    %27 = vector.shape_cast %26 : vector<8xf32> to vector<8x1xf32>
    %c0_13 = arith.constant 0 : index
    %c0_14 = arith.constant 0 : index
    %c0_15 = arith.constant 0 : index
    %c1 = arith.constant 1 : index
    %28 = vector.load %arg4[%c0_13, %c0_14, %c0_15, %c1] : memref<1x1x8x4xf32, #tpu.memory_space<vmem>>, vector<1x1x8x1xf32>
    %29 = vector.shape_cast %28 : vector<1x1x8x1xf32> to vector<8x1xf32>
    %30 = vector.shape_cast %27 : vector<8x1xf32> to vector<1x1x8x1xf32>
    tpu.vector_store %arg4[%c0_13, %c0_14, %c0_15, %c1], %30 {strides = array<i32>} : memref<1x1x8x4xf32, #tpu.memory_space<vmem>>, vector<1x1x8x1xf32>,
    %cst_16 = arith.constant dense<0.000000e+00> : vector<8xf32>
    %31 = vector.multi_reduction <add>, %1, %cst_16 [1] : vector<8x256xf32> to vector<8xf32>
    %32 = vector.shape_cast %31 : vector<8xf32> to vector<8x1xf32>
    %c0_17 = arith.constant 0 : index
    %c0_18 = arith.constant 0 : index
    %c0_19 = arith.constant 0 : index
    %c2 = arith.constant 2 : index
    %33 = vector.load %arg4[%c0_17, %c0_18, %c0_19, %c2] : memref<1x1x8x4xf32, #tpu.memory_space<vmem>>, vector<1x1x8x1xf32>
    %34 = vector.shape_cast %33 : vector<1x1x8x1xf32> to vector<8x1xf32>
    %35 = vector.shape_cast %32 : vector<8x1xf32> to vector<1x1x8x1xf32>
    tpu.vector_store %arg4[%c0_17, %c0_18, %c0_19, %c2], %35 {strides = array<i32>} : memref<1x1x8x4xf32, #tpu.memory_space<vmem>>, vector<1x1x8x1xf32>,
    %cst_20 = arith.constant dense<0.000000e+00> : vector<8xf32>
    %36 = vector.multi_reduction <add>, %19, %cst_20 [1] : vector<8x256xf32> to vector<8xf32>
    %37 = vector.shape_cast %36 : vector<8xf32> to vector<8x1xf32>
    %c0_21 = arith.constant 0 : index
    %c0_22 = arith.constant 0 : index
    %c0_23 = arith.constant 0 : index
    %c3 = arith.constant 3 : index
    %38 = vector.load %arg4[%c0_21, %c0_22, %c0_23, %c3] : memref<1x1x8x4xf32, #tpu.memory_space<vmem>>, vector<1x1x8x1xf32>
    %39 = vector.shape_cast %38 : vector<1x1x8x1xf32> to vector<8x1xf32>
    %40 = vector.shape_cast %37 : vector<8x1xf32> to vector<1x1x8x1xf32>
    tpu.vector_store %arg4[%c0_21, %c0_22, %c0_23, %c3], %40 {strides = array<i32>} : memref<1x1x8x4xf32, #tpu.memory_space<vmem>>, vector<1x1x8x1xf32>,
    return
  }
  func.func @transform_0(%arg0: i32, %arg1: i32) -> (i32, i32) {
    %c0_i32 = arith.constant 0 : i32
    return %arg0, %arg1 : i32, i32
  }
  func.func @transform_1(%arg0: i32, %arg1: i32) -> (i32, i32) {
    %c0_i32 = arith.constant 0 : i32
    return %arg0, %arg1 : i32, i32
  }
  func.func @transform_2(%arg0: i32, %arg1: i32) -> (i32, i32, i32, i32) {
    %c0_i32 = arith.constant 0 : i32
    %c0_i32_0 = arith.constant 0 : i32
    %c0_i32_1 = arith.constant 0 : i32
    return %arg0, %arg1, %c0_i32, %c0_i32_0 : i32, i32, i32, i32
  }
}

</mosaic_0001>

<bundles_post_ra>
// kernel: dc_and_bce_loss.1
= control target key start
LH: loop header
LB: loop body
LE: loop exit
PB: predicated region body
PF: predicated region fallthrough
CT: control target
= control target key end

     0   :  { %vm66_vm4 = vcmask 7168   ;;  %vm71_vm5 = vcmask 15368   ;;  %vm76_vm6 = vcmask 23568   ;;  %vm81_vm7 = vcmask 31768   ;;  %s138_s0 = inlined_call_operand.vmem [shape: f32[8,256], index: 0, kind: input, shape index: {}]   ;;  %s139_s1 = inlined_call_operand.vmem [shape: f32[8,256], index: 1, kind: input, shape index: {}]   ;;  %s140_s2 = inlined_call_operand.vmem [shape: f32[1,1,8,4], index: 2, kind: output, shape index: {}]  }
   0x1   :  { %v11_v0 = vld [vmem:[%s138_s0] sm:$0xff]  ;;  %v12_v1 = vld [vmem:[%s138_s0 + $0x8] sm:$0xff] }
   0x2   :  { %v13_v2 = vld [vmem:[%s139_s1] sm:$0xff]  ;;  %v14_v3 = vld [vmem:[%s139_s1 + $0x8] sm:$0xff]  ;;  %v15_v4 = vand.u32 2147483647, %v11_v0  ;;  %v16_v5 = vand.u32 2147483647, %v12_v1 }
   0x3   :  { %v73_v6 = vadd.f32 %v14_v3, %v13_v2  ;;  %v37_v18 = vmul.f32 %v13_v2, %v11_v0  ;;  %v35_v19 = vmax.f32 %v11_v0, 0.0  ;;  %v38_v22 = vmul.f32 %v14_v3, %v12_v1 }
   0x4   :  { %v17_v7 = vsub.f32 0.0, %v15_v4  ;;  %v18_v8 = vsub.f32 0.0, %v16_v5  ;;  %v36_v23 = vmax.f32 %v12_v1, 0.0  ;;  %vm29_vm0 = vcmp.ge.f32.partialorder %v11_v0, 0.0 }
   0x5   :  { %74 = vadd.xlane.f32.xlu1 %v73_v6  ;;  %vm30_vm1 = vcmp.ge.f32.partialorder %v12_v1, 0.0  ;;  %v39_v31 = vsub.f32 %v35_v19, %v37_v18 }
   0x6   :  { %v19_v9 = vmul.f32 1.442695, %v17_v7  ;;  %v21_v10 = vmul.f32 1.442695, %v18_v8  ;;  %v40_v35 = vsub.f32 %v36_v23, %v38_v22 }
   0x8   :  { %87 = vpow2.f32 %v19_v9 }
   0x9   :  { %89 = vpow2.f32 %v21_v10 }
  0x12   :  { %v88_v11 = vpop.eup %87 }
  0x13   :  { %v90_v12 = vpop.eup %89  ;;  %v23_v13 = vadd.f32 1.0, %v88_v11  ;;  %v44_v15 = vmul.f32 -0.5, %v88_v11  ;;  %v47_v20 = vand.u32 2147483647, %v88_v11 }
  0x14   :  { %v24_v14 = vadd.f32 1.0, %v90_v12  ;;  %v53_v16 = vmul.f32 -0.5, %v90_v12  ;;  %v56_v24 = vand.u32 2147483647, %v90_v12 }
  0x15   :  { %91 = vrcp.f32 %v23_v13  ;;  %v45_v17 = vadd.f32 1.0, %v44_v15  ;;  %vm48_vm2 = vcmp.lt.f32.partialorder %v47_v20, 0.0004427343 }
  0x16   :  { %93 = vrcp.f32 %v24_v14  ;;  %v54_v21 = vadd.f32 1.0, %v53_v16  ;;  %vm57_vm3 = vcmp.lt.f32.partialorder %v56_v24, 0.0004427343 }
  0x17   :  { %95 = vlog2.f32 %v23_v13  ;;  %v46_v28 = vmul.f32 %v88_v11, %v45_v17 }
  0x18   :  { %97 = vlog2.f32 %v24_v14  ;;  %v55_v32 = vmul.f32 %v90_v12, %v54_v21 }
  0x1f   :  { %v92_v25 = vpop.eup %91 }
  0x20   :  { %v94_v26 = vpop.eup %93  ;;  %v31_v27 = vmul.f32 %v92_v25, %v88_v11 }
  0x21   :  { %v96_v29 = vpop.eup %95  ;;  %v32_v30 = vmul.f32 %v94_v26, %v90_v12 }
  0x22   :  { %v98_v33 = vpop.eup %97  ;;  %v33_v34 = vsel %vm29_vm0, %v92_v25, %v31_v27  ;;  %v43_v36 = vmul.f32 0.6931472, %v96_v29 }
  0x23   :  { %v34_v37 = vsel %vm30_vm1, %v94_v26, %v32_v30  ;;  %v61_v38 = vmul.f32 %v33_v34, %v13_v2  ;;  %v52_v39 = vmul.f32 0.6931472, %v98_v33 }
  0x24   :  { %v62_v40 = vmul.f32 %v34_v37, %v14_v3  ;;  %v49_v41 = vsel %vm48_vm2, %v46_v28, %v43_v36  ;;  %v68_v46 = vadd.f32 %v34_v37, %v33_v34 }
  0x25   :  { %v58_v42 = vsel %vm57_vm3, %v55_v32, %v52_v39  ;;  %v59_v43 = vadd.f32 %v49_v41, %v39_v31 }
  0x26   :  { %v63_v44 = vadd.f32 %v62_v40, %v61_v38  ;;  %v60_v45 = vadd.f32 %v58_v42, %v40_v35 }
  0x28   :  { %64 = vadd.xlane.f32.xlu0 %v63_v44  ;;  %v78_v47 = vadd.f32 %v60_v45, %v59_v43 }
  0x2a   :  { %79 = vadd.xlane.f32.xlu1 %v78_v47 }
  0x2c   :  { %69 = vadd.xlane.f32.xlu0 %v68_v46 }
  0x92   :  { %v75_v48 = vpop.xlane.xlu1 %74 }
  0xb5   :  { %v65_v49 = vpop.xlane.xlu0 %64 }
  0xb6   :  { %67 = vst.msk [vmem:[%s140_s2] sm:$0xff] %vm66_vm4, %v65_v49 }
  0xb7   :  { %v80_v51 = vpop.xlane.xlu1 %79 }
  0xb9   :  { %v70_v50 = vpop.xlane.xlu0 %69 }
  0xba   :  { %72 = vst.msk [vmem:[%s140_s2] sm:$0xff] %vm71_vm5, %v70_v50 }
  0xbb   :  { %77 = vst.msk [vmem:[%s140_s2] sm:$0xff] %vm76_vm6, %v75_v48 }
  0xbc   :  { %82 = vst.msk [vmem:[%s140_s2] sm:$0xff] %vm81_vm7, %v80_v51 }

</bundles_post_ra>
